<compile_context>
chip_gen: v7x
topology: tpu7x:2x2x1
jax: 0.10.0
libtpu: 0.0.40
codegen_flags: <defaults>
</compile_context>

<pallas_src>
import functools
from typing import NamedTuple

import jax
import jax.numpy as jnp
from jax.experimental import pallas as pl
from jax.experimental.pallas import tpu as pltpu


_VMEM_LIMIT_BYTES = 32 * 1024 * 1024   # raises v5e's 16 MiB scoped default
_SINGLE_BUFFER_WEIGHTS = True          # flipped off at runtime if unsupported


def _round_up(x, m):
    return (x + m - 1) // m * m


def _pick_row_tile(m, max_tile):
    """Row tile: 8-aligned, <= max_tile, and (when possible) >= 2 grid steps
    along the parallel axis so v7x's second TensorCore gets work."""
    if m <= 8:
        return m                               # single full-dim block
    half = _round_up(pl.cdiv(m, 2), 8)
    return min(max_tile, half)


def _pick_k_tile(k, max_k_tile):
    """K tile: must divide K exactly (K-edge garbage would corrupt the
    reduction) and be a multiple of 128 whenever it is not the full K."""
    if k <= max_k_tile or k % 128 != 0:
        return k
    tk = max_k_tile - (max_k_tile % 128)
    while tk >= 128:
        if k % tk == 0:
            return tk
        tk -= 128
    return k


def _const_spec(shape, index_map):
    """BlockSpec for a grid-invariant operand (W / b): single-buffered so only
    one copy is resident in VMEM (halves weight VMEM at production dims)."""
    if _SINGLE_BUFFER_WEIGHTS and hasattr(pl, "Buffered"):
        try:
            return pl.BlockSpec(shape, index_map, pipeline_mode=pl.Buffered(1))
        except TypeError:                      # older BlockSpec signature
            pass
    return pl.BlockSpec(shape, index_map)


# ----------------------------------------------------------------------------
# Kernels
# ----------------------------------------------------------------------------
def _frame_sum_f32(x_ref):
    """Sum frames (axis=1) of a (tb, F, tk) ref into a (tb, tk) f32
    accumulator without materializing the full tile in vregs."""
    tb, num_frames, tk = x_ref.shape

    def body(f, acc):
        return acc + x_ref[:, f, :].astype(jnp.float32)

    return jax.lax.fori_loop(0, num_frames, body,
                             jnp.zeros((tb, tk), jnp.float32), unroll=True)


def _row_block(x_ref, w_dtype, pooled):
    if pooled:
        return _frame_sum_f32(x_ref).astype(w_dtype)
    return x_ref[...].astype(w_dtype)


def _affine_store(acc, b_ref, o_ref, normalize):
    y = acc + b_ref[...]
    if normalize:
        # torch F.normalize: y / max(||y||_2, 1e-12).  Pad columns of W / b
        # are exactly zero, so the norm over the padded width equals the true
        # norm over the real D columns.  rsqrt -> EUP slot (free-ish).
        sq = jnp.sum(y * y, axis=-1, keepdims=True)
        y = y * jax.lax.rsqrt(jnp.maximum(sq, 1e-24))
    o_ref[...] = y.astype(o_ref.dtype)


def _proj_kernel(x_ref, w_ref, b_ref, o_ref, *, normalize, pooled):
    # Single K step: fused (frame-pool ->) matmul -> bias -> (L2 norm) -> store.
    rows = _row_block(x_ref, w_ref.dtype, pooled)
    y = jnp.dot(rows, w_ref[...], preferred_element_type=jnp.float32)
    _affine_store(y, b_ref, o_ref, normalize)


def _proj_kernel_ktiled(x_ref, w_ref, b_ref, o_ref, acc_ref, *,
                        normalize, pooled):
    # K grid-tiled (reduction axis last) with a resident f32 accumulator:
    # init at k == 0, bias + normalize + store at the last k.  The full embed
    # row stays in one output tile so the fused L2 normalize remains exact.
    k = pl.program_id(1)

    @pl.when(k == 0)
    def _init():
        acc_ref[...] = jnp.zeros_like(acc_ref)

    rows = _row_block(x_ref, w_ref.dtype, pooled)
    acc_ref[...] += jnp.dot(rows, w_ref[...],
                            preferred_element_type=jnp.float32)

    @pl.when(k == pl.num_programs(1) - 1)
    def _finish():
        _affine_store(acc_ref[...], b_ref, o_ref, normalize)


# ----------------------------------------------------------------------------
# pallas_call wrappers
# ----------------------------------------------------------------------------
def _project_call(x, w, b, *, pooled, normalize, out_dtype=jnp.float32,
                  max_row_tile=256, max_k_tile=512):
    if pooled:
        m, num_frames, k_dim = x.shape
    else:
        m, k_dim = x.shape
    assert w.shape[0] == k_dim
    n_pad = w.shape[1]
    assert n_pad % 128 == 0, "embed dim must be lane-padded (see prepare_*)"
    assert b.shape == (1, n_pad)

    tm = _pick_row_tile(m, max_row_tile)
    tk = _pick_k_tile(k_dim, max_k_tile)
    grid_m = pl.cdiv(m, tm)
    num_k = k_dim // tk

    if num_k == 1:
        grid = (grid_m,)
        if pooled:
            x_spec = pl.BlockSpec((tm, num_frames, k_dim), lambda i: (i, 0, 0))
        else:
            x_spec = pl.BlockSpec((tm, k_dim), lambda i: (i, 0))
        in_specs = [x_spec,
                    _const_spec((k_dim, n_pad), lambda i: (0, 0)),
                    _const_spec((1, n_pad), lambda i: (0, 0))]
        out_spec = pl.BlockSpec((tm, n_pad), lambda i: (i, 0))
        scratch = ()
        dims = ("parallel",)
        kernel = functools.partial(_proj_kernel, normalize=normalize,
                                   pooled=pooled)
    else:
        grid = (grid_m, num_k)                 # reduction axis last
        if pooled:
            x_spec = pl.BlockSpec((tm, num_frames, tk),
                                  lambda i, kk: (i, 0, kk))
        else:
            x_spec = pl.BlockSpec((tm, tk), lambda i, kk: (i, kk))
        in_specs = [x_spec,
                    pl.BlockSpec((tk, n_pad), lambda i, kk: (kk, 0)),
                    _const_spec((1, n_pad), lambda i, kk: (0, 0))]
        out_spec = pl.BlockSpec((tm, n_pad), lambda i, kk: (i, 0))
        scratch = (pltpu.VMEM((tm, n_pad), jnp.float32),)
        dims = ("parallel", "arbitrary")
        kernel = functools.partial(_proj_kernel_ktiled, normalize=normalize,
                                   pooled=pooled)

    return pl.pallas_call(
        kernel,
        out_shape=jax.ShapeDtypeStruct((m, n_pad), out_dtype),
        grid_spec=pltpu.PrefetchScalarGridSpec(
            num_scalar_prefetch=0,
            grid=grid,
            in_specs=in_specs,
            out_specs=out_spec,
            scratch_shapes=scratch,
        ),
        compiler_params=pltpu.CompilerParams(
            dimension_semantics=dims,
            vmem_limit_bytes=_VMEM_LIMIT_BYTES),
    )(x, w, b)


def clip_project(x, w, b, *, normalize=False, out_dtype=jnp.float32,
                 max_row_tile=256, max_k_tile=512):
    """x: (M, K) f32 -> (M, Np): x @ W + b, optionally L2-normalized."""
    return _project_call(x, w, b, pooled=False, normalize=normalize,
                         out_dtype=out_dtype, max_row_tile=max_row_tile,
                         max_k_tile=max_k_tile)


def clip_pool_project(x, w_pooled, b, *, normalize=True, out_dtype=jnp.float32,
                      max_row_tile=256, max_k_tile=512):
    """x: (B, F, K) f32 -> (B, Np).  Frame mean is folded into the matmul:
    mean_f(x) @ W + b == sum_f(x) @ (W / F) + b, with W / F prepared once."""
    return _project_call(x, w_pooled, b, pooled=True, normalize=normalize,
                         out_dtype=out_dtype, max_row_tile=max_row_tile,
                         max_k_tile=max_k_tile)


# ----------------------------------------------------------------------------
# ZeroNLG-facing wrappers
# ----------------------------------------------------------------------------
class ClipProjectionParams(NamedTuple):
    w: jax.Array          # (K, Np) compute-dtype weight, zero-padded columns
    w_pooled: jax.Array   # (K, Np) weight pre-scaled by 1/num_frames
    b: jax.Array          # (1, Np) f32 bias, zero-padded
    d_out: int            # true embedding width D (<= Np)
    num_frames: int


def prepare_clip_projection(w, b, *, num_frames=8,
                            compute_dtype=jnp.bfloat16):
    """One-time prep (hoisted out of the per-call path): pad the embed dim to
    a lane-dense multiple of 128 with zero columns, cast to the matmul dtype
    and pre-fold 1/num_frames into the pooled-path weight.

    compute_dtype gates matmul precision: bf16 operands with f32 accumulation
    by default; pass jnp.float32 to match the full-precision PyTorch path.
    """
    _, d = w.shape
    n_pad = max(128, _round_up(d, 128))
    w_p = jnp.pad(w.astype(jnp.float32), ((0, 0), (0, n_pad - d)))
    b_p = jnp.pad(b.reshape(1, -1).astype(jnp.float32),
                  ((0, 0), (0, n_pad - d)))
    return ClipProjectionParams(
        w=w_p.astype(compute_dtype),
        w_pooled=(w_p * (1.0 / num_frames)).astype(compute_dtype),
        b=b_p,
        d_out=d,
        num_frames=num_frames)


def zeronlg_get_image_embeddings(image_feats, params, *, mean_pooling=True,
                                 normalize=True, out_dtype=jnp.float32,
                                 return_padded=False):
    """Mirror of ZeroNLG.get_image_embeddings for pre-extracted frame features.

    image_feats: (B, F, D_in) f32 video frame features.
    params:      ClipProjectionParams from prepare_clip_projection.
    Returns (B, D) if mean_pooling else (B, F, D).  Pass return_padded=True to
    skip the trailing slice and keep the lane-padded width Np (zero columns).
    """
    bsz, num_frames, _ = image_feats.shape
    if mean_pooling:
        assert num_frames == params.num_frames, (
            "1/num_frames is folded into params.w_pooled; re-run "
            "prepare_clip_projection for a different frame count")
        out = clip_pool_project(image_feats, params.w_pooled, params.b,
                                normalize=normalize, out_dtype=out_dtype)
        return out if return_padded else out[:, :params.d_out]

    flat = image_feats.reshape(bsz * num_frames, -1)
    out = clip_project(flat, params.w, params.b, normalize=normalize,
                       out_dtype=out_dtype)
    if not return_padded:
        out = out[:, :params.d_out]
    return out.reshape(bsz, num_frames, -1)


# ----------------------------------------------------------------------------
# Demo / self-check
# ----------------------------------------------------------------------------
if __name__ == "__main__":
    key = jax.random.PRNGKey(0)
    B, F, D_in, D = 2, 8, 64, 32   # batch, frames, clip feature dim, embed dim

    k1, k2, k3 = jax.random.split(key, 3)
    image_feats = jax.random.normal(k1, (B, F, D_in), dtype=jnp.float32)
    w = (jax.random.normal(k2, (D_in, D), dtype=jnp.float32)
         / jnp.sqrt(jnp.float32(D_in)))
    bias = jax.random.normal(k3, (D,), dtype=jnp.float32) * 0.01

    params = prepare_clip_projection(w, bias, num_frames=F,
                                     compute_dtype=jnp.bfloat16)
    params_f32 = prepare_clip_projection(w, bias, num_frames=F,
                                         compute_dtype=jnp.float32)

    # Second toy config exercising the K-grid-tiled accumulator path (the
    # production-dims layout) with max_k_tile=128.
    k4, k5, k6, k7 = jax.random.split(jax.random.PRNGKey(1), 4)
    Mk, Bk, Fk, Kk, Dk = 16, 16, 4, 256, 128
    xk = jax.random.normal(k4, (Mk, Kk), dtype=jnp.float32)
    xkp = jax.random.normal(k7, (Bk, Fk, Kk), dtype=jnp.float32)
    wk = jax.random.normal(k5, (Kk, Dk), dtype=jnp.float32) / 16.0
    bk = jax.random.normal(k6, (Dk,), dtype=jnp.float32) * 0.01
    wk_bf = wk.astype(jnp.bfloat16)
    wk_pool_bf = (wk * (1.0 / Fk)).astype(jnp.bfloat16)
    bk_row = bk.reshape(1, -1)

    def run_all():
        pooled = zeronlg_get_image_embeddings(
            image_feats, params, mean_pooling=True, normalize=True)
        frames = zeronlg_get_image_embeddings(
            image_feats, params, mean_pooling=False, normalize=True)
        raw = zeronlg_get_image_embeddings(       # forward_caption embeddings
            image_feats, params, mean_pooling=False, normalize=False)
        pooled_f32 = zeronlg_get_image_embeddings(
            image_feats, params_f32, mean_pooling=True, normalize=True)
        ktiled = clip_project(xk, wk_bf, bk_row, normalize=True,
                              max_k_tile=128)
        ktiled_pool = clip_pool_project(xkp, wk_pool_bf, bk_row,
                                        normalize=True, max_k_tile=128)
        return jax.block_until_ready(
            (pooled, frames, raw, pooled_f32, ktiled, ktiled_pool))

    try:
        (pooled_out, frame_out, raw_out, pooled_f32_out,
         ktiled_out, ktiled_pool_out) = run_all()
    except Exception:
        # Fallback for JAX builds where single-buffered (Buffered(1)) weight
        # specs are not supported by the Mosaic pipeline; genuine failures
        # will re-raise on the retry.
        _SINGLE_BUFFER_WEIGHTS = False
        (pooled_out, frame_out, raw_out, pooled_f32_out,
         ktiled_out, ktiled_pool_out) = run_all()

    # --- Pure-JAX references -------------------------------------------------
    b_row = bias.reshape(1, -1)

    def _l2norm(y):
        return y / jnp.maximum(
            jnp.linalg.norm(y, axis=-1, keepdims=True), 1e-12)

    # mean_pooling=True, bf16 matmul (mirror the kernel's casts: f32 frame sum
    # -> bf16, times the bf16 pre-scaled weight, f32 accumulation).
    w_pool_bf = (w * (1.0 / F)).astype(jnp.bfloat16).astype(jnp.float32)
    pooled_sum = jnp.sum(image_feats, axis=1)
    y1 = pooled_sum.astype(jnp.bfloat16).astype(jnp.float32) @ w_pool_bf + b_row
    ref_pooled = _l2norm(y1)

    # mean_pooling=False paths (per-frame projection, bf16 matmul).
    x_bf = image_feats.astype(jnp.bfloat16).astype(jnp.float32)
    w_bf = w.astype(jnp.bfloat16).astype(jnp.float32)
    y2 = (x_bf.reshape(B * F, D_in) @ w_bf + b_row).reshape(B, F, D)
    ref_frames = _l2norm(y2)
    ref_raw = y2

    # Full-f32 gate (torch semantics).  Loose tolerance: the XLA reference f32
    # matmul precision on TPU is backend-default while the kernel's is native.
    y3 = jnp.mean(image_feats, axis=1) @ w + b_row
    ref_pooled_f32 = _l2norm(y3)

    # K-tiled paths (bf16 matmul, matched casts).
    yk = (xk.astype(jnp.bfloat16).astype(jnp.float32)
          @ wk_bf.astype(jnp.float32) + bk_row)
    ref_ktiled = _l2norm(yk)
    ykp = (jnp.sum(xkp, axis=1).astype(jnp.bfloat16).astype(jnp.float32)
           @ wk_pool_bf.astype(jnp.float32) + bk_row)
    ref_ktiled_pool = _l2norm(ykp)

    assert pooled_out.shape == (B, D)
    assert frame_out.shape == (B, F, D)
    assert raw_out.shape == (B, F, D)
    assert pooled_f32_out.shape == (B, D)
    assert ktiled_out.shape == (Mk, Dk)
    assert ktiled_pool_out.shape == (Bk, Dk)
    # Pooled bf16 paths: the f32 frame-sum order may differ from jnp.sum by a
    # few ulps before the bf16 cast, so use a slightly looser tolerance there.
    assert jnp.allclose(pooled_out, ref_pooled, atol=5e-3, rtol=5e-3)
    assert jnp.allclose(frame_out, ref_frames, atol=1e-4, rtol=1e-4)
    assert jnp.allclose(raw_out, ref_raw, atol=1e-4, rtol=1e-4)
    assert jnp.allclose(pooled_f32_out, ref_pooled_f32, atol=2e-2, rtol=2e-2)
    assert jnp.allclose(ktiled_out, ref_ktiled, atol=1e-4, rtol=1e-4)
    assert jnp.allclose(ktiled_pool_out, ref_ktiled_pool, atol=5e-3, rtol=5e-3)

    print("KERNEL_OK")
</pallas_src>

<mosaic_0001>
module attributes {stable_mosaic.version = 11 : i64} {
  func.func @_proj_kernel(%arg0: i32, %arg1: memref<2x8x64xf32, #tpu.memory_space<vmem>>, %arg2: memref<64x128xbf16, #tpu.memory_space<vmem>>, %arg3: memref<1x128xf32, #tpu.memory_space<vmem>>, %arg4: memref<2x128xf32, #tpu.memory_space<vmem>>) attributes {dimension_semantics = [#tpu.dimension_semantics<parallel>], iteration_bounds = array<i64: 1>, scalar_prefetch = 0 : i64, scratch_operands = 0 : i64, tpu.core_type = #tpu.core_type<tc>, window_params = [{transform_indices = @transform_0, window_bounds = array<i64: 2, 8, 64>}, {pipeline_mode = #tpu.pipeline_mode<synchronous>, transform_indices = @transform_1, window_bounds = array<i64: 64, 128>}, {pipeline_mode = #tpu.pipeline_mode<synchronous>, transform_indices = @transform_2, window_bounds = array<i64: 1, 128>}, {transform_indices = @transform_3, window_bounds = array<i64: 2, 128>}]} {
    %cst = arith.constant 0.000000e+00 : f32
    %0 = vector.broadcast %cst : f32 to vector<2x64xf32>
    %c0_i32 = arith.constant 0 : i32
    %c0 = arith.constant 0 : index
    %1 = arith.index_cast %c0_i32 : i32 to index
    %c0_0 = arith.constant 0 : index
    %2 = vector.load %arg1[%c0, %1, %c0_0] : memref<2x8x64xf32, #tpu.memory_space<vmem>>, vector<2x1x64xf32>
    %3 = vector.shape_cast %2 : vector<2x1x64xf32> to vector<2x64xf32>
    %4 = arith.addf %0, %3 : vector<2x64xf32>
    %c1_i32 = arith.constant 1 : i32
    %c0_1 = arith.constant 0 : index
    %5 = arith.index_cast %c1_i32 : i32 to index
    %c0_2 = arith.constant 0 : index
    %6 = vector.load %arg1[%c0_1, %5, %c0_2] : memref<2x8x64xf32, #tpu.memory_space<vmem>>, vector<2x1x64xf32>
    %7 = vector.shape_cast %6 : vector<2x1x64xf32> to vector<2x64xf32>
    %8 = arith.addf %4, %7 : vector<2x64xf32>
    %c2_i32 = arith.constant 2 : i32
    %c0_3 = arith.constant 0 : index
    %9 = arith.index_cast %c2_i32 : i32 to index
    %c0_4 = arith.constant 0 : index
    %10 = vector.load %arg1[%c0_3, %9, %c0_4] : memref<2x8x64xf32, #tpu.memory_space<vmem>>, vector<2x1x64xf32>
    %11 = vector.shape_cast %10 : vector<2x1x64xf32> to vector<2x64xf32>
    %12 = arith.addf %8, %11 : vector<2x64xf32>
    %c3_i32 = arith.constant 3 : i32
    %c0_5 = arith.constant 0 : index
    %13 = arith.index_cast %c3_i32 : i32 to index
    %c0_6 = arith.constant 0 : index
    %14 = vector.load %arg1[%c0_5, %13, %c0_6] : memref<2x8x64xf32, #tpu.memory_space<vmem>>, vector<2x1x64xf32>
    %15 = vector.shape_cast %14 : vector<2x1x64xf32> to vector<2x64xf32>
    %16 = arith.addf %12, %15 : vector<2x64xf32>
    %c4_i32 = arith.constant 4 : i32
    %c0_7 = arith.constant 0 : index
    %17 = arith.index_cast %c4_i32 : i32 to index
    %c0_8 = arith.constant 0 : index
    %18 = vector.load %arg1[%c0_7, %17, %c0_8] : memref<2x8x64xf32, #tpu.memory_space<vmem>>, vector<2x1x64xf32>
    %19 = vector.shape_cast %18 : vector<2x1x64xf32> to vector<2x64xf32>
    %20 = arith.addf %16, %19 : vector<2x64xf32>
    %c5_i32 = arith.constant 5 : i32
    %c0_9 = arith.constant 0 : index
    %21 = arith.index_cast %c5_i32 : i32 to index
    %c0_10 = arith.constant 0 : index
    %22 = vector.load %arg1[%c0_9, %21, %c0_10] : memref<2x8x64xf32, #tpu.memory_space<vmem>>, vector<2x1x64xf32>
    %23 = vector.shape_cast %22 : vector<2x1x64xf32> to vector<2x64xf32>
    %24 = arith.addf %20, %23 : vector<2x64xf32>
    %c6_i32 = arith.constant 6 : i32
    %c0_11 = arith.constant 0 : index
    %25 = arith.index_cast %c6_i32 : i32 to index
    %c0_12 = arith.constant 0 : index
    %26 = vector.load %arg1[%c0_11, %25, %c0_12] : memref<2x8x64xf32, #tpu.memory_space<vmem>>, vector<2x1x64xf32>
    %27 = vector.shape_cast %26 : vector<2x1x64xf32> to vector<2x64xf32>
    %28 = arith.addf %24, %27 : vector<2x64xf32>
    %c7_i32 = arith.constant 7 : i32
    %c0_13 = arith.constant 0 : index
    %29 = arith.index_cast %c7_i32 : i32 to index
    %c0_14 = arith.constant 0 : index
    %30 = vector.load %arg1[%c0_13, %29, %c0_14] : memref<2x8x64xf32, #tpu.memory_space<vmem>>, vector<2x1x64xf32>
    %31 = vector.shape_cast %30 : vector<2x1x64xf32> to vector<2x64xf32>
    %32 = arith.addf %28, %31 : vector<2x64xf32>
    %c8_i32 = arith.constant 8 : i32
    %33 = arith.truncf %32 : vector<2x64xf32> to vector<2x64xbf16>
    %c0_15 = arith.constant 0 : index
    %c0_16 = arith.constant 0 : index
    %34 = vector.load %arg2[%c0_15, %c0_16] : memref<64x128xbf16, #tpu.memory_space<vmem>>, vector<64x128xbf16>
    %cst_17 = arith.constant dense<0.000000e+00> : vector<2x128xf32>
    %35 = tpu.matmul %33, %34, %cst_17 {dimension_numbers = #tpu.dot_dimension_numbers<[1], [0], [0], [1], [0, 0, 1, 1], [], []>} : vector<2x64xbf16>, vector<64x128xbf16>, vector<2x128xf32> -> vector<2x128xf32>
    %c0_18 = arith.constant 0 : index
    %c0_19 = arith.constant 0 : index
    %36 = vector.load %arg3[%c0_18, %c0_19] : memref<1x128xf32, #tpu.memory_space<vmem>>, vector<1x128xf32>
    %37 = vector.broadcast %36 : vector<1x128xf32> to vector<2x128xf32>
    %38 = arith.addf %35, %37 : vector<2x128xf32>
    %39 = arith.mulf %38, %38 : vector<2x128xf32>
    %cst_20 = arith.constant dense<0.000000e+00> : vector<2xf32>
    %40 = vector.multi_reduction <add>, %39, %cst_20 [1] : vector<2x128xf32> to vector<2xf32>
    %41 = vector.shape_cast %40 : vector<2xf32> to vector<2x1xf32>
    %cst_21 = arith.constant 1.000000e-24 : f32
    %42 = vector.broadcast %cst_21 : f32 to vector<2x1xf32>
    %43 = arith.maximumf %41, %42 : vector<2x1xf32>
    %44 = math.rsqrt %43 : vector<2x1xf32>
    %45 = vector.broadcast %44 : vector<2x1xf32> to vector<2x128xf32>
    %46 = arith.mulf %38, %45 : vector<2x128xf32>
    %c0_22 = arith.constant 0 : index
    %c0_23 = arith.constant 0 : index
    %47 = vector.load %arg4[%c0_22, %c0_23] : memref<2x128xf32, #tpu.memory_space<vmem>>, vector<2x128xf32>
    tpu.vector_store %arg4[%c0_22, %c0_23], %46 {strides = array<i32>} : memref<2x128xf32, #tpu.memory_space<vmem>>, vector<2x128xf32>,
    return
  }
  func.func @transform_0(%arg0: i32) -> (i32, i32, i32) {
    %c0_i32 = arith.constant 0 : i32
    %c0_i32_0 = arith.constant 0 : i32
    %c0_i32_1 = arith.constant 0 : i32
    return %arg0, %c0_i32, %c0_i32_0 : i32, i32, i32
  }
  func.func @transform_1(%arg0: i32) -> (i32, i32) {
    %c0_i32 = arith.constant 0 : i32
    %c0_i32_0 = arith.constant 0 : i32
    %c0_i32_1 = arith.constant 0 : i32
    return %c0_i32, %c0_i32_0 : i32, i32
  }
  func.func @transform_2(%arg0: i32) -> (i32, i32) {
    %c0_i32 = arith.constant 0 : i32
    %c0_i32_0 = arith.constant 0 : i32
    %c0_i32_1 = arith.constant 0 : i32
    return %c0_i32, %c0_i32_0 : i32, i32
  }
  func.func @transform_3(%arg0: i32) -> (i32, i32) {
    %c0_i32 = arith.constant 0 : i32
    %c0_i32_0 = arith.constant 0 : i32
    return %arg0, %c0_i32 : i32, i32
  }
}

module attributes {stable_mosaic.version = 11 : i64} {
  func.func @_proj_kernel(%arg0: i32, %arg1: memref<2x8x64xf32, #tpu.memory_space<vmem>>, %arg2: memref<64x128xbf16, #tpu.memory_space<vmem>>, %arg3: memref<1x128xf32, #tpu.memory_space<vmem>>, %arg4: memref<2x128xf32, #tpu.memory_space<vmem>>) attributes {dimension_semantics = [#tpu.dimension_semantics<parallel>], iteration_bounds = array<i64: 1>, scalar_prefetch = 0 : i64, scratch_operands = 0 : i64, tpu.core_type = #tpu.core_type<tc>, window_params = [{transform_indices = @transform_0, window_bounds = array<i64: 2, 8, 64>}, {pipeline_mode = #tpu.pipeline_mode<synchronous>, transform_indices = @transform_1, window_bounds = array<i64: 64, 128>}, {pipeline_mode = #tpu.pipeline_mode<synchronous>, transform_indices = @transform_2, window_bounds = array<i64: 1, 128>}, {transform_indices = @transform_3, window_bounds = array<i64: 2, 128>}]} {
    %cst = arith.constant 0.000000e+00 : f32
    %0 = vector.broadcast %cst : f32 to vector<2x64xf32>
    %c0_i32 = arith.constant 0 : i32
    %c0 = arith.constant 0 : index
    %1 = arith.index_cast %c0_i32 : i32 to index
    %c0_0 = arith.constant 0 : index
    %2 = vector.load %arg1[%c0, %1, %c0_0] : memref<2x8x64xf32, #tpu.memory_space<vmem>>, vector<2x1x64xf32>
    %3 = vector.shape_cast %2 : vector<2x1x64xf32> to vector<2x64xf32>
    %4 = arith.addf %0, %3 : vector<2x64xf32>
    %c1_i32 = arith.constant 1 : i32
    %c0_1 = arith.constant 0 : index
    %5 = arith.index_cast %c1_i32 : i32 to index
    %c0_2 = arith.constant 0 : index
    %6 = vector.load %arg1[%c0_1, %5, %c0_2] : memref<2x8x64xf32, #tpu.memory_space<vmem>>, vector<2x1x64xf32>
    %7 = vector.shape_cast %6 : vector<2x1x64xf32> to vector<2x64xf32>
    %8 = arith.addf %4, %7 : vector<2x64xf32>
    %c2_i32 = arith.constant 2 : i32
    %c0_3 = arith.constant 0 : index
    %9 = arith.index_cast %c2_i32 : i32 to index
    %c0_4 = arith.constant 0 : index
    %10 = vector.load %arg1[%c0_3, %9, %c0_4] : memref<2x8x64xf32, #tpu.memory_space<vmem>>, vector<2x1x64xf32>
    %11 = vector.shape_cast %10 : vector<2x1x64xf32> to vector<2x64xf32>
    %12 = arith.addf %8, %11 : vector<2x64xf32>
    %c3_i32 = arith.constant 3 : i32
    %c0_5 = arith.constant 0 : index
    %13 = arith.index_cast %c3_i32 : i32 to index
    %c0_6 = arith.constant 0 : index
    %14 = vector.load %arg1[%c0_5, %13, %c0_6] : memref<2x8x64xf32, #tpu.memory_space<vmem>>, vector<2x1x64xf32>
    %15 = vector.shape_cast %14 : vector<2x1x64xf32> to vector<2x64xf32>
    %16 = arith.addf %12, %15 : vector<2x64xf32>
    %c4_i32 = arith.constant 4 : i32
    %c0_7 = arith.constant 0 : index
    %17 = arith.index_cast %c4_i32 : i32 to index
    %c0_8 = arith.constant 0 : index
    %18 = vector.load %arg1[%c0_7, %17, %c0_8] : memref<2x8x64xf32, #tpu.memory_space<vmem>>, vector<2x1x64xf32>
    %19 = vector.shape_cast %18 : vector<2x1x64xf32> to vector<2x64xf32>
    %20 = arith.addf %16, %19 : vector<2x64xf32>
    %c5_i32 = arith.constant 5 : i32
    %c0_9 = arith.constant 0 : index
    %21 = arith.index_cast %c5_i32 : i32 to index
    %c0_10 = arith.constant 0 : index
    %22 = vector.load %arg1[%c0_9, %21, %c0_10] : memref<2x8x64xf32, #tpu.memory_space<vmem>>, vector<2x1x64xf32>
    %23 = vector.shape_cast %22 : vector<2x1x64xf32> to vector<2x64xf32>
    %24 = arith.addf %20, %23 : vector<2x64xf32>
    %c6_i32 = arith.constant 6 : i32
    %c0_11 = arith.constant 0 : index
    %25 = arith.index_cast %c6_i32 : i32 to index
    %c0_12 = arith.constant 0 : index
    %26 = vector.load %arg1[%c0_11, %25, %c0_12] : memref<2x8x64xf32, #tpu.memory_space<vmem>>, vector<2x1x64xf32>
    %27 = vector.shape_cast %26 : vector<2x1x64xf32> to vector<2x64xf32>
    %28 = arith.addf %24, %27 : vector<2x64xf32>
    %c7_i32 = arith.constant 7 : i32
    %c0_13 = arith.constant 0 : index
    %29 = arith.index_cast %c7_i32 : i32 to index
    %c0_14 = arith.constant 0 : index
    %30 = vector.load %arg1[%c0_13, %29, %c0_14] : memref<2x8x64xf32, #tpu.memory_space<vmem>>, vector<2x1x64xf32>
    %31 = vector.shape_cast %30 : vector<2x1x64xf32> to vector<2x64xf32>
    %32 = arith.addf %28, %31 : vector<2x64xf32>
    %c8_i32 = arith.constant 8 : i32
    %33 = arith.truncf %32 : vector<2x64xf32> to vector<2x64xbf16>
    %c0_15 = arith.constant 0 : index
    %c0_16 = arith.constant 0 : index
    %34 = vector.load %arg2[%c0_15, %c0_16] : memref<64x128xbf16, #tpu.memory_space<vmem>>, vector<64x128xbf16>
    %cst_17 = arith.constant dense<0.000000e+00> : vector<2x128xf32>
    %35 = tpu.matmul %33, %34, %cst_17 {dimension_numbers = #tpu.dot_dimension_numbers<[1], [0], [0], [1], [0, 0, 1, 1], [], []>} : vector<2x64xbf16>, vector<64x128xbf16>, vector<2x128xf32> -> vector<2x128xf32>
    %c0_18 = arith.constant 0 : index
    %c0_19 = arith.constant 0 : index
    %36 = vector.load %arg3[%c0_18, %c0_19] : memref<1x128xf32, #tpu.memory_space<vmem>>, vector<1x128xf32>
    %37 = vector.broadcast %36 : vector<1x128xf32> to vector<2x128xf32>
    %38 = arith.addf %35, %37 : vector<2x128xf32>
    %39 = arith.mulf %38, %38 : vector<2x128xf32>
    %cst_20 = arith.constant dense<0.000000e+00> : vector<2xf32>
    %40 = vector.multi_reduction <add>, %39, %cst_20 [1] : vector<2x128xf32> to vector<2xf32>
    %41 = vector.shape_cast %40 : vector<2xf32> to vector<2x1xf32>
    %cst_21 = arith.constant 1.000000e-24 : f32
    %42 = vector.broadcast %cst_21 : f32 to vector<2x1xf32>
    %43 = arith.maximumf %41, %42 : vector<2x1xf32>
    %44 = math.rsqrt %43 : vector<2x1xf32>
    %45 = vector.broadcast %44 : vector<2x1xf32> to vector<2x128xf32>
    %46 = arith.mulf %38, %45 : vector<2x128xf32>
    %c0_22 = arith.constant 0 : index
    %c0_23 = arith.constant 0 : index
    %47 = vector.load %arg4[%c0_22, %c0_23] : memref<2x128xf32, #tpu.memory_space<vmem>>, vector<2x128xf32>
    tpu.vector_store %arg4[%c0_22, %c0_23], %46 {strides = array<i32>} : memref<2x128xf32, #tpu.memory_space<vmem>>, vector<2x128xf32>,
    return
  }
  func.func @transform_0(%arg0: i32) -> (i32, i32, i32) {
    %c0_i32 = arith.constant 0 : i32
    %c0_i32_0 = arith.constant 0 : i32
    %c0_i32_1 = arith.constant 0 : i32
    return %arg0, %c0_i32, %c0_i32_0 : i32, i32, i32
  }
  func.func @transform_1(%arg0: i32) -> (i32, i32) {
    %c0_i32 = arith.constant 0 : i32
    %c0_i32_0 = arith.constant 0 : i32
    %c0_i32_1 = arith.constant 0 : i32
    return %c0_i32, %c0_i32_0 : i32, i32
  }
  func.func @transform_2(%arg0: i32) -> (i32, i32) {
    %c0_i32 = arith.constant 0 : i32
    %c0_i32_0 = arith.constant 0 : i32
    %c0_i32_1 = arith.constant 0 : i32
    return %c0_i32, %c0_i32_0 : i32, i32
  }
  func.func @transform_3(%arg0: i32) -> (i32, i32) {
    %c0_i32 = arith.constant 0 : i32
    %c0_i32_0 = arith.constant 0 : i32
    return %arg0, %c0_i32 : i32, i32
  }
}

</mosaic_0001>

<bundles_post_ra>
// kernel: tpu_custom_call.1
= control target key start
LH: loop header
LB: loop body
LE: loop exit
PB: predicated region body
PF: predicated region fallthrough
CT: control target
= control target key end

     0   :  { %8 = vsyncpa [#allocation3], 0  ;;  %s372_s0 = inlined_call_operand.hbm [shape: f32[2,8,64], index: 0, kind: input, shape index: {}]   ;;  %s373_s1 = inlined_call_operand.hbm [shape: bf16[64,128], index: 1, kind: input, shape index: {}]   ;;  %s374_s2 = inlined_call_operand.vmem [shape: f32[1,128], index: 2, kind: input, shape index: {}]   ;;  %s375_s3 = inlined_call_operand.hbm [shape: f32[2,128], index: 3, kind: output, shape index: {}]  }
   0x1   :  { %9 = vsyncpa [#allocation6], 0 }
   0x2   :  { %10 = vsyncpa [#allocation4], 0  ;;  %s304_s12 = smov [#allocation2]   ;;  %s232_s16 = scalar_lea.hbm %s372_s0, 256 }
   0x3   :  { %s16_s13 = sshll.u32 %s304_s12, 4  ;;  %p233_p0 = scmp.ne.s32.totalorder %s372_s0, %s232_s16  ;;  %s17_s13 = int_to_ptr.vmem [resolvable:$true] %s16_s13 }
   0x4   :  { %p236_p1 = scmp.lt.u32.totalorder %s232_s16, %s372_s0 }
   0x6   :  { %p238_p2 = pnand %p236_p1, %p233_p0 }
   0x8   :  { %241 = shalt.err (!%p238_p2)
}
   0x9   :  { %s242_s21 = scalar_lea.vmem %s17_s13, 256  ;;  %p247_p4 = scmp.lt.s32.totalorder %s17_s13, %s17_s13 }
   0xa   :  { %p243_p3 = scmp.ne.s32.totalorder %s17_s13, %s242_s21  ;;  %p248_p5 = scmp.lt.s32.totalorder %s242_s21, %s242_s21 }
   0xc   :  { %p249_p6 = por %p248_p5, %p247_p4 }
   0xe   :  { %p250_p7 = pnand %p249_p6, %p243_p3 }
  0x10   :  { %253 = shalt.err (!%p250_p7)
}
  0x11   :  { %s305_s22 = smov 128   ;;  %s306_s23 = smov 8  }
  0x12   :  { %22 = dma.hbm_to_vmem [thread:$0]  %s372_s0, 256, %s17_s13, [#allocation3], %s305_s22, %s305_s22, %s306_s23  }
  0x13   :  { %s307_s26 = smov [#allocation5]   ;;  %s254_s30 = scalar_lea.hbm %s373_s1, 512 }
  0x14   :  { %s28_s27 = sshll.u32 %s307_s26, 4  ;;  %p255_p8 = scmp.ne.s32.totalorder %s373_s1, %s254_s30  ;;  %s29_s27 = int_to_ptr.vmem [resolvable:$true] %s28_s27 }
  0x15   :  { %p258_p9 = scmp.lt.u32.totalorder %s254_s30, %s373_s1 }
  0x17   :  { %p260_p10 = pnand %p258_p9, %p255_p8 }
  0x19   :  { %263 = shalt.err (!%p260_p10)
}
  0x1a   :  { %s264_s8 = scalar_lea.vmem %s29_s27, 512  ;;  %p269_p12 = scmp.lt.s32.totalorder %s29_s27, %s29_s27 }
  0x1b   :  { %p265_p11 = scmp.ne.s32.totalorder %s29_s27, %s264_s8  ;;  %p270_p13 = scmp.lt.s32.totalorder %s264_s8, %s264_s8 }
  0x1d   :  { %p271_p0 = por %p270_p13, %p269_p12 }
  0x1f   :  { %p272_p1 = pnand %p271_p0, %p265_p11 }
  0x21   :  { %275 = shalt.err (!%p272_p1)
}
  0x22   :  { %s308_s0 = smov 64   ;;  %s309_s9 = smov 4  }
  0x23   :  { %34 = dma.hbm_to_vmem [thread:$0]  %s373_s1, 512, %s29_s27, [#allocation6], %s308_s0, %s308_s0, %s309_s9  }
  0x24   :  { %298 = dma.done.wait [#allocation3], 256  }
  0x25   :  { %299 = vsyncadd [#allocation3], 4294967040 }
  0x26   :  { %300 = dma.done.wait [#allocation6], 512  }
  0x27   :  { %301 = vsyncadd [#allocation6], 4294966784  ;;  %v310_v0 = vmov 0.0   ;;  %vm311_vm0 = vmmov 0   ;;  %v226_v1 = vld [vmem:[#allocation5] sm:$0xff]   ;;  %v227_v2 = vld [vmem:[#allocation5 + $0x8] sm:$0xff]  }
  0x28   :  { %205 = vmatprep.subr.bf16.mxu0 %v310_v0  ;;  %213 = vmatprep.mubr.msk.bf16.mxu0 %vm311_vm0, %v310_v0  ;;  %v44_v3 = vld [vmem:[#allocation2] sm:$0x1]  ;;  %v45_v4 = vld [vmem:[#allocation2 + $0x8] sm:$0x1]  ;;  %v48_v5 = vld [vmem:[#allocation2 + $0x1] sm:$0x1] }
  0x29   :  { %206 = vmatpush3.bf16.msra.mxu0 %v226_v1  ;;  %v49_v6 = vld [vmem:[#allocation2 + $0x9] sm:$0x1]  ;;  %v50_v7 = vadd.f32 %v48_v5, %v44_v3  ;;  %v52_v8 = vld [vmem:[#allocation2 + $0x2] sm:$0x1]  ;;  %v53_v9 = vld [vmem:[#allocation2 + $0xa] sm:$0x1] }
  0x2a   :  { %207 = vmatprep.subr.bf16.mxu0 %v310_v0  ;;  %v228_v10 = vld [vmem:[#allocation5 + $0x10] sm:$0xff]   ;;  %v51_v11 = vadd.f32 %v49_v6, %v45_v4  ;;  %v57_v14 = vld [vmem:[#allocation2 + $0xb] sm:$0x1]  ;;  %v61_v18 = vld [vmem:[#allocation2 + $0xc] sm:$0x1]  ;;  %vm98_vm1 = vcmask 1041409  }
  0x2b   :  { %v56_v12 = vld [vmem:[#allocation2 + $0x3] sm:$0x1]  ;;  %v54_v13 = vadd.f32 %v52_v8, %v50_v7  ;;  %v60_v16 = vld [vmem:[#allocation2 + $0x4] sm:$0x1]  ;;  %v229_v19 = vld [vmem:[#allocation5 + $0x18] sm:$0xff]   ;;  %vm125_vm2 = vcmask 523264  }
  0x2c   :  { %v55_v15 = vadd.f32 %v53_v9, %v51_v11  ;;  %v64_v21 = vld [vmem:[#allocation2 + $0x5] sm:$0x1]  ;;  %v65_v23 = vld [vmem:[#allocation2 + $0xd] sm:$0x1]  ;;  %v68_v25 = vld [vmem:[#allocation2 + $0x6] sm:$0x1] }
  0x2d   :  { %208 = vmatpush3.bf16.msra.mxu0 %v227_v2  ;;  %v58_v17 = vadd.f32 %v56_v12, %v54_v13  ;;  %v69_v27 = vld [vmem:[#allocation2 + $0xe] sm:$0x1]  ;;  %v72_v29 = vld [vmem:[#allocation2 + $0x7] sm:$0x1]  ;;  %v73_v31 = vld [vmem:[#allocation2 + $0xf] sm:$0x1] }
  0x2e   :  { %209 = vmatprep.subr.bf16.mxu0 %v310_v0  ;;  %v59_v20 = vadd.f32 %v57_v14, %v55_v15  ;;  %v194_v42 = vld [vmem:[%s374_s2] ss:$0 sm:$0xff]  ;;  %vm170_vm3 = vcmask 1041408   ;;  %s312_s13 = smov [#allocation7]  }
  0x2f   :  { %v62_v22 = vadd.f32 %v60_v16, %v58_v17  ;;  %s184_s14 = sshll.u32 %s312_s13, 4  ;;  %s185_s14 = int_to_ptr.vmem [resolvable:$true] %s184_s14 }
  0x30   :  { %v63_v24 = vadd.f32 %v61_v18, %v59_v20  ;;  %s276_s15 = scalar_lea.vmem %s185_s14, 32  ;;  %p281_p3 = scmp.lt.s32.totalorder %s185_s14, %s185_s14 }
  0x31   :  { %210 = vmatpush3.bf16.msra.mxu0 %v228_v10  ;;  %v66_v26 = vadd.f32 %v64_v21, %v62_v22  ;;  %p277_p2 = scmp.ne.s32.totalorder %s185_s14, %s276_s15  ;;  %p282_p4 = scmp.lt.s32.totalorder %s276_s15, %s276_s15 }
  0x32   :  { %211 = vmatprep.subr.bf16.mxu0 %v310_v0  ;;  %v67_v28 = vadd.f32 %v65_v23, %v63_v24 }
  0x33   :  { %v70_v30 = vadd.f32 %v68_v25, %v66_v26  ;;  %p283_p5 = por %p282_p4, %p281_p3 }
  0x34   :  { %v71_v32 = vadd.f32 %v69_v27, %v67_v28 }
  0x35   :  { %212 = vmatpush3.bf16.msra.mxu0 %v229_v19  ;;  %v74_v33 = vadd.f32 %v72_v29, %v70_v30  ;;  %p284_p6 = pnand %p283_p5, %p277_p2 }
  0x36   :  { %v75_v34 = vadd.f32 %v73_v31, %v71_v32 }
  0x37   :  { %v76_v35 = vpack.c.bf16 %v74_v33, %v74_v33 }
  0x38   :  { %v77_v36 = vpack.c.bf16 %v75_v34, %v75_v34 }
  0x39   :  { %v95_v37 = vunpack.c.l.b16 %v76_v35 }
  0x3a   :  { %v96_v38 = vunpack.c.l.b16 %v77_v36 }
  0x3c   :  { %v97_v39 = vrot.slane %v96_v38, 7 }
  0x3e   :  { %v99_v40 = vsel %vm98_vm1, %v97_v39, %v95_v37 }
  0x3f   :  { %v100_v41 = vpack.c.b16 %v99_v40, %v99_v40 }
  0x41   :  { %214 = vmatmul.mubr.msk.bf16.vlgmr.msra.gmra.mrb[0].mxu0 %vm125_vm2, %v100_v41 }
 0x114   :  { %v163_v43 = vpop.f32.mrb[0].mxu0 }
 0x115   :  { %v164_v44 = vadd.f32 %v194_v42, %v163_v43  ;;  %v215_v45 = vpop.f32.mrb[1].mxu0 }
 0x116   :  { %v166_v46 = vpop.f32.mrb[2].mxu0 }
 0x117   :  { %v216_v47 = vpop.f32.mrb[3].mxu0  ;;  %v169_v48 = vmul.f32 %v164_v44, %v164_v44 }
 0x119   :  { %v171_v49 = vsel %vm170_vm3, %v169_v48, 0.0 }
 0x11a   :  { %172 = vadd.xlane.f32.xlu0 %v171_v49 }
 0x1a7   :  { %v173_v50 = vpop.xlane.xlu0 %172 }
 0x1a8   :  { %v174_v51 = vmax.f32 %v173_v50, 1e-24 }
 0x1aa   :  { %230 = vrsqrt.f32 %v174_v51 }
 0x1b4   :  { %v231_v52 = vpop.eup %230 }
 0x1b5   :  { %v176_v53 = vmul.f32 %v231_v52, %v164_v44 }
 0x1b7   :  { %177 = vst [vmem:[#allocation7] sm:$0x3] %v176_v53 }
 0x1b8   :  { %287 = shalt.err (!%p284_p6)
}
 0x1b9   :  { %s288_s17 = scalar_lea.hbm %s375_s3, 32 }
 0x1ba   :  { %p289_p7 = scmp.ne.s32.totalorder %s375_s3, %s288_s17  ;;  %p292_p8 = scmp.lt.u32.totalorder %s288_s17, %s375_s3 }
 0x1bc   :  { %p294_p9 = pnand %p292_p8, %p289_p7 }
 0x1be   :  { %297 = shalt.err (!%p294_p9)
}
 0x1bf   :  { %187 = dma.vmem_to_hbm [thread:$0]  %s185_s14, 32, %s375_s3, [#allocation4]  }
 0x1c0   :  { %302 = dma.done.wait [#allocation4], 32  }
 0x1c1   :  { %303 = vsyncadd [#allocation4], 4294967264 }
 0x1c2   :  { %191 = vsyncpa [#allocation3], 1 }
 0x1c3   :  { %192 = vsyncpa [#allocation6], 1 }
 0x1c4   :  { %193 = vsyncpa [#allocation4], 1 }

// kernel: tpu_custom_call.1
= control target key start
LH: loop header
LB: loop body
LE: loop exit
PB: predicated region body
PF: predicated region fallthrough
CT: control target
= control target key end

     0   :  { %8 = vsyncpa [#allocation3], 0  ;;  %s372_s0 = inlined_call_operand.hbm [shape: f32[2,8,64], index: 0, kind: input, shape index: {}]   ;;  %s373_s1 = inlined_call_operand.hbm [shape: bf16[64,128], index: 1, kind: input, shape index: {}]   ;;  %s374_s2 = inlined_call_operand.vmem [shape: f32[1,128], index: 2, kind: input, shape index: {}]   ;;  %s375_s3 = inlined_call_operand.hbm [shape: f32[2,128], index: 3, kind: output, shape index: {}]  }
   0x1   :  { %9 = vsyncpa [#allocation6], 0 }
   0x2   :  { %10 = vsyncpa [#allocation4], 0  ;;  %s304_s12 = smov [#allocation2]   ;;  %s232_s16 = scalar_lea.hbm %s372_s0, 256 }
   0x3   :  { %s16_s13 = sshll.u32 %s304_s12, 4  ;;  %p233_p0 = scmp.ne.s32.totalorder %s372_s0, %s232_s16  ;;  %s17_s13 = int_to_ptr.vmem [resolvable:$true] %s16_s13 }
   0x4   :  { %p236_p1 = scmp.lt.u32.totalorder %s232_s16, %s372_s0 }
   0x6   :  { %p238_p2 = pnand %p236_p1, %p233_p0 }
   0x8   :  { %241 = shalt.err (!%p238_p2)
}
   0x9   :  { %s242_s21 = scalar_lea.vmem %s17_s13, 256  ;;  %p247_p4 = scmp.lt.s32.totalorder %s17_s13, %s17_s13 }
   0xa   :  { %p243_p3 = scmp.ne.s32.totalorder %s17_s13, %s242_s21  ;;  %p248_p5 = scmp.lt.s32.totalorder %s242_s21, %s242_s21 }
   0xc   :  { %p249_p6 = por %p248_p5, %p247_p4 }
   0xe   :  { %p250_p7 = pnand %p249_p6, %p243_p3 }
  0x10   :  { %253 = shalt.err (!%p250_p7)
}
  0x11   :  { %s305_s22 = smov 128   ;;  %s306_s23 = smov 8  }
  0x12   :  { %22 = dma.hbm_to_vmem [thread:$0]  %s372_s0, 256, %s17_s13, [#allocation3], %s305_s22, %s305_s22, %s306_s23  }
  0x13   :  { %s307_s26 = smov [#allocation5]   ;;  %s254_s30 = scalar_lea.hbm %s373_s1, 512 }
  0x14   :  { %s28_s27 = sshll.u32 %s307_s26, 4  ;;  %p255_p8 = scmp.ne.s32.totalorder %s373_s1, %s254_s30  ;;  %s29_s27 = int_to_ptr.vmem [resolvable:$true] %s28_s27 }
  0x15   :  { %p258_p9 = scmp.lt.u32.totalorder %s254_s30, %s373_s1 }
  0x17   :  { %p260_p10 = pnand %p258_p9, %p255_p8 }
  0x19   :  { %263 = shalt.err (!%p260_p10)
}
  0x1a   :  { %s264_s8 = scalar_lea.vmem %s29_s27, 512  ;;  %p269_p12 = scmp.lt.s32.totalorder %s29_s27, %s29_s27 }
  0x1b   :  { %p265_p11 = scmp.ne.s32.totalorder %s29_s27, %s264_s8  ;;  %p270_p13 = scmp.lt.s32.totalorder %s264_s8, %s264_s8 }
  0x1d   :  { %p271_p0 = por %p270_p13, %p269_p12 }
  0x1f   :  { %p272_p1 = pnand %p271_p0, %p265_p11 }
  0x21   :  { %275 = shalt.err (!%p272_p1)
}
  0x22   :  { %s308_s0 = smov 64   ;;  %s309_s9 = smov 4  }
  0x23   :  { %34 = dma.hbm_to_vmem [thread:$0]  %s373_s1, 512, %s29_s27, [#allocation6], %s308_s0, %s308_s0, %s309_s9  }
  0x24   :  { %298 = dma.done.wait [#allocation3], 256  }
  0x25   :  { %299 = vsyncadd [#allocation3], 4294967040 }
  0x26   :  { %300 = dma.done.wait [#allocation6], 512  }
  0x27   :  { %301 = vsyncadd [#allocation6], 4294966784  ;;  %v310_v0 = vmov 0.0   ;;  %vm311_vm0 = vmmov 0   ;;  %v226_v1 = vld [vmem:[#allocation5] sm:$0xff]   ;;  %v227_v2 = vld [vmem:[#allocation5 + $0x8] sm:$0xff]  }
  0x28   :  { %205 = vmatprep.subr.bf16.mxu0 %v310_v0  ;;  %213 = vmatprep.mubr.msk.bf16.mxu0 %vm311_vm0, %v310_v0  ;;  %v44_v3 = vld [vmem:[#allocation2] sm:$0x1]  ;;  %v45_v4 = vld [vmem:[#allocation2 + $0x8] sm:$0x1]  ;;  %v48_v5 = vld [vmem:[#allocation2 + $0x1] sm:$0x1] }
  0x29   :  { %206 = vmatpush3.bf16.msra.mxu0 %v226_v1  ;;  %v49_v6 = vld [vmem:[#allocation2 + $0x9] sm:$0x1]  ;;  %v50_v7 = vadd.f32 %v48_v5, %v44_v3  ;;  %v52_v8 = vld [vmem:[#allocation2 + $0x2] sm:$0x1]  ;;  %v53_v9 = vld [vmem:[#allocation2 + $0xa] sm:$0x1] }
  0x2a   :  { %207 = vmatprep.subr.bf16.mxu0 %v310_v0  ;;  %v228_v10 = vld [vmem:[#allocation5 + $0x10] sm:$0xff]   ;;  %v51_v11 = vadd.f32 %v49_v6, %v45_v4  ;;  %v57_v14 = vld [vmem:[#allocation2 + $0xb] sm:$0x1]  ;;  %v61_v18 = vld [vmem:[#allocation2 + $0xc] sm:$0x1]  ;;  %vm98_vm1 = vcmask 1041409  }
  0x2b   :  { %v56_v12 = vld [vmem:[#allocation2 + $0x3] sm:$0x1]  ;;  %v54_v13 = vadd.f32 %v52_v8, %v50_v7  ;;  %v60_v16 = vld [vmem:[#allocation2 + $0x4] sm:$0x1]  ;;  %v229_v19 = vld [vmem:[#allocation5 + $0x18] sm:$0xff]   ;;  %vm125_vm2 = vcmask 523264  }
  0x2c   :  { %v55_v15 = vadd.f32 %v53_v9, %v51_v11  ;;  %v64_v21 = vld [vmem:[#allocation2 + $0x5] sm:$0x1]  ;;  %v65_v23 = vld [vmem:[#allocation2 + $0xd] sm:$0x1]  ;;  %v68_v25 = vld [vmem:[#allocation2 + $0x6] sm:$0x1] }
  0x2d   :  { %208 = vmatpush3.bf16.msra.mxu0 %v227_v2  ;;  %v58_v17 = vadd.f32 %v56_v12, %v54_v13  ;;  %v69_v27 = vld [vmem:[#allocation2 + $0xe] sm:$0x1]  ;;  %v72_v29 = vld [vmem:[#allocation2 + $0x7] sm:$0x1]  ;;  %v73_v31 = vld [vmem:[#allocation2 + $0xf] sm:$0x1] }
  0x2e   :  { %209 = vmatprep.subr.bf16.mxu0 %v310_v0  ;;  %v59_v20 = vadd.f32 %v57_v14, %v55_v15  ;;  %v194_v42 = vld [vmem:[%s374_s2] ss:$0 sm:$0xff]  ;;  %vm170_vm3 = vcmask 1041408   ;;  %s312_s13 = smov [#allocation7]  }
  0x2f   :  { %v62_v22 = vadd.f32 %v60_v16, %v58_v17  ;;  %s184_s14 = sshll.u32 %s312_s13, 4  ;;  %s185_s14 = int_to_ptr.vmem [resolvable:$true] %s184_s14 }
  0x30   :  { %v63_v24 = vadd.f32 %v61_v18, %v59_v20  ;;  %s276_s15 = scalar_lea.vmem %s185_s14, 32  ;;  %p281_p3 = scmp.lt.s32.totalorder %s185_s14, %s185_s14 }
  0x31   :  { %210 = vmatpush3.bf16.msra.mxu0 %v228_v10  ;;  %v66_v26 = vadd.f32 %v64_v21, %v62_v22  ;;  %p277_p2 = scmp.ne.s32.totalorder %s185_s14, %s276_s15  ;;  %p282_p4 = scmp.lt.s32.totalorder %s276_s15, %s276_s15 }
  0x32   :  { %211 = vmatprep.subr.bf16.mxu0 %v310_v0  ;;  %v67_v28 = vadd.f32 %v65_v23, %v63_v24 }
  0x33   :  { %v70_v30 = vadd.f32 %v68_v25, %v66_v26  ;;  %p283_p5 = por %p282_p4, %p281_p3 }
  0x34   :  { %v71_v32 = vadd.f32 %v69_v27, %v67_v28 }
  0x35   :  { %212 = vmatpush3.bf16.msra.mxu0 %v229_v19  ;;  %v74_v33 = vadd.f32 %v72_v29, %v70_v30  ;;  %p284_p6 = pnand %p283_p5, %p277_p2 }
  0x36   :  { %v75_v34 = vadd.f32 %v73_v31, %v71_v32 }
  0x37   :  { %v76_v35 = vpack.c.bf16 %v74_v33, %v74_v33 }
  0x38   :  { %v77_v36 = vpack.c.bf16 %v75_v34, %v75_v34 }
  0x39   :  { %v95_v37 = vunpack.c.l.b16 %v76_v35 }
  0x3a   :  { %v96_v38 = vunpack.c.l.b16 %v77_v36 }
  0x3c   :  { %v97_v39 = vrot.slane %v96_v38, 7 }
  0x3e   :  { %v99_v40 = vsel %vm98_vm1, %v97_v39, %v95_v37 }
  0x3f   :  { %v100_v41 = vpack.c.b16 %v99_v40, %v99_v40 }
  0x41   :  { %214 = vmatmul.mubr.msk.bf16.vlgmr.msra.gmra.mrb[0].mxu0 %vm125_vm2, %v100_v41 }
 0x114   :  { %v163_v43 = vpop.f32.mrb[0].mxu0 }
 0x115   :  { %v164_v44 = vadd.f32 %v194_v42, %v163_v43  ;;  %v215_v45 = vpop.f32.mrb[1].mxu0 }
 0x116   :  { %v166_v46 = vpop.f32.mrb[2].mxu0 }
 0x117   :  { %v216_v47 = vpop.f32.mrb[3].mxu0  ;;  %v169_v48 = vmul.f32 %v164_v44, %v164_v44 }
 0x119   :  { %v171_v49 = vsel %vm170_vm3, %v169_v48, 0.0 }
 0x11a   :  { %172 = vadd.xlane.f32.xlu0 %v171_v49 }
 0x1a7   :  { %v173_v50 = vpop.xlane.xlu0 %172 }
 0x1a8   :  { %v174_v51 = vmax.f32 %v173_v50, 1e-24 }
 0x1aa   :  { %230 = vrsqrt.f32 %v174_v51 }
 0x1b4   :  { %v231_v52 = vpop.eup %230 }
 0x1b5   :  { %v176_v53 = vmul.f32 %v231_v52, %v164_v44 }
 0x1b7   :  { %177 = vst [vmem:[#allocation7] sm:$0x3] %v176_v53 }
 0x1b8   :  { %287 = shalt.err (!%p284_p6)
}
 0x1b9   :  { %s288_s17 = scalar_lea.hbm %s375_s3, 32 }
 0x1ba   :  { %p289_p7 = scmp.ne.s32.totalorder %s375_s3, %s288_s17  ;;  %p292_p8 = scmp.lt.u32.totalorder %s288_s17, %s375_s3 }
 0x1bc   :  { %p294_p9 = pnand %p292_p8, %p289_p7 }
 0x1be   :  { %297 = shalt.err (!%p294_p9)
}
 0x1bf   :  { %187 = dma.vmem_to_hbm [thread:$0]  %s185_s14, 32, %s375_s3, [#allocation4]  }
 0x1c0   :  { %302 = dma.done.wait [#allocation4], 32  }
 0x1c1   :  { %303 = vsyncadd [#allocation4], 4294967264 }
 0x1c2   :  { %191 = vsyncpa [#allocation3], 1 }
 0x1c3   :  { %192 = vsyncpa [#allocation6], 1 }
 0x1c4   :  { %193 = vsyncpa [#allocation4], 1 }

</bundles_post_ra>
